<compile_context>
chip_gen: v7x
topology: tpu7x:2x2x1
jax: 0.10.0
libtpu: 0.0.40
codegen_flags: <defaults>
</compile_context>

<pallas_src>
import functools

import jax
import jax.numpy as jnp
from jax import lax
from jax.experimental import pallas as pl
from jax.experimental.pallas import tpu as pltpu


def _word_encoder_kernel(x_ref, wfc_ref, bfc_ref, wup_ref, o_ref,
                         m_sc, l_sc, acc_sc, *, n_rows, tile_n):
    """One grid step processes TN rows of the flattened [N, D] input.

    x_ref:   [TN, D]  streamed input rows (compute dtype: bf16 or f32)
    wfc_ref: [D, H]   fc weight, pre-transposed, compute dtype (resident)
    bfc_ref: [1, H]   fc bias, f32 (resident)
    wup_ref: [1, H]   upw weight as a lane-dense row, f32 (resident)
    o_ref:   [1, D]   pooled output (written on the last grid step)
    m_sc:    [1, 1]   running max of logits        (f32 scratch)
    l_sc:    [1, 1]   running softmax denominator  (f32 scratch)
    acc_sc:  [1, D]   running weighted sum         (f32 scratch)
    """
    i = pl.program_id(0)

    @pl.when(i == 0)
    def _init():
        m_sc[...] = jnp.full(m_sc.shape, -jnp.inf, jnp.float32)
        l_sc[...] = jnp.zeros(l_sc.shape, jnp.float32)
        acc_sc[...] = jnp.zeros(acc_sc.shape, jnp.float32)

    x = x_ref[...]                                        # [TN, D], native dtype

    # h = tanh(x @ Wfc^T + b_fc)   -> [TN, H]   (MXU, fp32 accumulate; EUP tanh)
    h = jnp.tanh(
        jnp.dot(x, wfc_ref[...], preferred_element_type=jnp.float32)
        + bfc_ref[...].astype(jnp.float32)
    )

    # logits = upw(h)   -> [TN, 1]
    # Lane-dense VPU mul + lane reduce instead of a lane-sparse [H,1] matmul.
    # The upw bias is omitted: it is a constant shift, invariant under softmax.
    logits = jnp.sum(h * wup_ref[...].astype(jnp.float32), axis=-1, keepdims=True)

    # Mask padded rows (only generated when N is not a multiple of TN).
    if n_rows % tile_n != 0:
        row = i * tile_n + lax.broadcasted_iota(jnp.int32, logits.shape, 0)
        logits = jnp.where(row < n_rows, logits, -jnp.inf)

    # Online softmax update over the row (N) axis.
    m_prev = m_sc[...]                                               # [1, 1]
    m_new = jnp.maximum(m_prev, jnp.max(logits, axis=0, keepdims=True))
    a = jnp.exp(m_prev - m_new)                                      # [1, 1]
    p = jnp.exp(logits - m_new)                                      # [TN, 1]
    l_sc[...] = a * l_sc[...] + jnp.sum(p, axis=0, keepdims=True)

    # Weighted pooling as an MXU contraction over the row axis: [TN,1]x[TN,D]->[1,D].
    pooled = lax.dot_general(
        p.astype(x.dtype), x, (((0,), (0,)), ((), ())),
        preferred_element_type=jnp.float32)
    acc_sc[...] = a * acc_sc[...] + pooled
    m_sc[...] = m_new

    @pl.when(i == pl.num_programs(0) - 1)
    def _finalize():
        # Single division, folded in once at finalize time.
        inv_l = pl.reciprocal(l_sc[...], approx=False)
        o_ref[...] = (acc_sc[...] * inv_l).astype(o_ref.dtype)


def word_encoder_forward(X, w_fc, b_fc, w_upw, b_upw, *,
                         tile_n=512, compute_dtype=jnp.bfloat16):
    """X: [B, S1, S2, D].  Weights in PyTorch Linear convention:
       w_fc [H, D] (H == D required by the module), b_fc [H],
       w_upw [1, H], b_upw [1] (b_upw is softmax-invariant and unused)."""
    del b_upw  # constant logit shift: no effect after softmax
    B, S1, S2, D = X.shape
    H, Din = w_fc.shape
    assert Din == D and H == D, "WordEncoder requires feature dim == hidden_dim"
    N = B * S1 * S2

    # Row tile: sublane-aligned, bounded by N; pad rows if N % TN != 0.
    # (Default TN=512 keeps 2x double-buffered (TN, D) tiles + resident weights
    #  far below the v7x 32 MiB scoped-VMEM default; raise for big-N throughput.)
    tn = min(int(tile_n), N)
    tn = max(8, -(-tn // 8) * 8)
    n_pad = -(-N // tn) * tn
    grid_n = n_pad // tn

    # Stream x (and fc weights) at the compute dtype: bf16 halves HBM bytes and
    # uses the bf16-native MXU on v6e/v7x (fp32 accumulate kept in the kernel).
    x_flat = X.reshape(N, D).astype(compute_dtype)
    if n_pad != N:
        x_flat = jnp.pad(x_flat, ((0, n_pad - N), (0, 0)))

    wfc_t = jnp.asarray(w_fc).T.astype(compute_dtype)          # [D, H]
    bfc = jnp.asarray(b_fc, jnp.float32).reshape(1, H)         # [1, H]
    wup_row = jnp.asarray(w_upw, jnp.float32).reshape(1, H)    # [1, H] lane-dense

    kernel = functools.partial(_word_encoder_kernel, n_rows=N, tile_n=tn)

    out = pl.pallas_call(
        kernel,
        out_shape=jax.ShapeDtypeStruct((1, D), jnp.float32),
        grid_spec=pltpu.PrefetchScalarGridSpec(
            num_scalar_prefetch=0,
            grid=(grid_n,),
            in_specs=[
                pl.BlockSpec((tn, D), lambda i: (i, 0)),   # streamed input rows
                pl.BlockSpec((D, H), lambda i: (0, 0)),    # resident fc weight
                pl.BlockSpec((1, H), lambda i: (0, 0)),    # resident fc bias
                pl.BlockSpec((1, H), lambda i: (0, 0)),    # resident upw row
            ],
            out_specs=pl.BlockSpec((1, D), lambda i: (0, 0)),
            scratch_shapes=[
                pltpu.VMEM((1, 1), jnp.float32),   # running max m
                pltpu.VMEM((1, 1), jnp.float32),   # running denom l
                pltpu.VMEM((1, D), jnp.float32),   # running weighted sum
            ],
        ),
        compiler_params=pltpu.CompilerParams(
            dimension_semantics=("arbitrary",)),   # reduction axis over N
    )(x_flat, wfc_t, bfc, wup_row)

    # match PyTorch output shape [1, 1, D]
    return out.reshape(1, 1, D)


def word_encoder_reference(X, w_fc, b_fc, w_upw, b_upw):
    """Pure-JAX reference mirroring the PyTorch forward (fp32)."""
    B, S1, S2, D = X.shape
    x = X.reshape(1, B * S1 * S2, D).astype(jnp.float32)
    h = jnp.tanh(jnp.einsum("bnd,hd->bnh", x, w_fc) + b_fc)
    logits = jnp.einsum("bnh,oh->bno", h, w_upw) + b_upw       # [1, N, 1]
    alpha = jax.nn.softmax(logits, axis=1)
    return jnp.sum(alpha * x, axis=1, keepdims=True)           # [1, 1, D]


if __name__ == "__main__":
    # Small, forward-consistent shapes: last dim must equal hidden_dim.
    B, S1, S2 = 2, 4, 8          # N = 64 flattened rows
    H = D = 128                  # hidden_dim == feature dim (lane-aligned)
    OUT = 1

    key = jax.random.PRNGKey(0)
    kx, k1, k2, k3, k4 = jax.random.split(key, 5)

    X = jax.random.normal(kx, (B, S1, S2, D), dtype=jnp.float32)
    # PyTorch Linear convention: [out, in].
    w_fc = jax.random.normal(k1, (H, H), dtype=jnp.float32) * 0.05
    b_fc = jax.random.normal(k2, (H,), dtype=jnp.float32) * 0.05
    w_upw = jax.random.normal(k3, (OUT, H), dtype=jnp.float32) * 0.05
    b_upw = jax.random.normal(k4, (OUT,), dtype=jnp.float32) * 0.05

    y_ref = word_encoder_reference(X, w_fc, b_fc, w_upw, b_upw)

    # fp32 path, 4 grid steps: exercises the online softmax across tiles.
    y32 = word_encoder_forward(X, w_fc, b_fc, w_upw, b_upw,
                               tile_n=16, compute_dtype=jnp.float32)
    y32 = jax.block_until_ready(y32)
    assert y32.shape == (1, 1, D), y32.shape
    assert jnp.allclose(y32, y_ref, atol=1e-4, rtol=1e-4), (
        float(jnp.max(jnp.abs(y32 - y_ref))))

    # fp32 path with a tile that does not divide N: exercises the pad mask.
    y32b = word_encoder_forward(X, w_fc, b_fc, w_upw, b_upw,
                                tile_n=24, compute_dtype=jnp.float32)
    y32b = jax.block_until_ready(y32b)
    assert jnp.allclose(y32b, y_ref, atol=1e-4, rtol=1e-4), (
        float(jnp.max(jnp.abs(y32b - y_ref))))

    # Default bf16-input / fp32-accumulate MXU path (looser bf16 tolerance).
    ybf = word_encoder_forward(X, w_fc, b_fc, w_upw, b_upw)
    ybf = jax.block_until_ready(ybf)
    assert ybf.shape == (1, 1, D), ybf.shape
    assert jnp.allclose(ybf, y_ref, atol=5e-2, rtol=5e-2), (
        float(jnp.max(jnp.abs(ybf - y_ref))))

    print("KERNEL_OK")
</pallas_src>

<mosaic_0001>
module attributes {stable_mosaic.version = 11 : i64} {
  func.func @_word_encoder_kernel(%arg0: i32, %arg1: memref<16x128xf32, #tpu.memory_space<vmem>>, %arg2: memref<128x128xf32, #tpu.memory_space<vmem>>, %arg3: memref<1x128xf32, #tpu.memory_space<vmem>>, %arg4: memref<1x128xf32, #tpu.memory_space<vmem>>, %arg5: memref<1x128xf32, #tpu.memory_space<vmem>>, %arg6: memref<1x1xf32, #tpu.memory_space<vmem>>, %arg7: memref<1x1xf32, #tpu.memory_space<vmem>>, %arg8: memref<1x128xf32, #tpu.memory_space<vmem>>) attributes {dimension_semantics = [#tpu.dimension_semantics<arbitrary>], iteration_bounds = array<i64: 4>, scalar_prefetch = 0 : i64, scratch_operands = 3 : i64, tpu.core_type = #tpu.core_type<tc>, window_params = [{transform_indices = @transform_0, window_bounds = array<i64: 16, 128>}, {pipeline_mode = #tpu.pipeline_mode<synchronous>, transform_indices = @transform_1, window_bounds = array<i64: 128, 128>}, {pipeline_mode = #tpu.pipeline_mode<synchronous>, transform_indices = @transform_2, window_bounds = array<i64: 1, 128>}, {pipeline_mode = #tpu.pipeline_mode<synchronous>, transform_indices = @transform_3, window_bounds = array<i64: 1, 128>}, {pipeline_mode = #tpu.pipeline_mode<synchronous>, transform_indices = @transform_4, window_bounds = array<i64: 1, 128>}]} {
    %c0_i32 = arith.constant 0 : i32
    %0 = arith.cmpi eq, %arg0, %c0_i32 : i32
    %1 = arith.extui %0 : i1 to i32
    %c0_i32_0 = arith.constant 0 : i32
    %2 = arith.cmpi ne, %1, %c0_i32_0 : i32
    scf.if %2 {
      %cst_25 = arith.constant 0xFF800000 : f32
      %40 = vector.broadcast %cst_25 : f32 to vector<1x1xf32>
      %c0_26 = arith.constant 0 : index
      %c0_27 = arith.constant 0 : index
      %41 = vector.load %arg6[%c0_26, %c0_27] : memref<1x1xf32, #tpu.memory_space<vmem>>, vector<1x1xf32>
      tpu.vector_store %arg6[%c0_26, %c0_27], %40 {strides = array<i32>} : memref<1x1xf32, #tpu.memory_space<vmem>>, vector<1x1xf32>,
      %cst_28 = arith.constant 0.000000e+00 : f32
      %42 = vector.broadcast %cst_28 : f32 to vector<1x1xf32>
      %c0_29 = arith.constant 0 : index
      %c0_30 = arith.constant 0 : index
      %43 = vector.load %arg7[%c0_29, %c0_30] : memref<1x1xf32, #tpu.memory_space<vmem>>, vector<1x1xf32>
      tpu.vector_store %arg7[%c0_29, %c0_30], %42 {strides = array<i32>} : memref<1x1xf32, #tpu.memory_space<vmem>>, vector<1x1xf32>,
      %cst_31 = arith.constant 0.000000e+00 : f32
      %44 = vector.broadcast %cst_31 : f32 to vector<1x128xf32>
      %c0_32 = arith.constant 0 : index
      %c0_33 = arith.constant 0 : index
      %45 = vector.load %arg8[%c0_32, %c0_33] : memref<1x128xf32, #tpu.memory_space<vmem>>, vector<1x128xf32>
      tpu.vector_store %arg8[%c0_32, %c0_33], %44 {strides = array<i32>} : memref<1x128xf32, #tpu.memory_space<vmem>>, vector<1x128xf32>,
    } else {
    }
    %c0 = arith.constant 0 : index
    %c0_1 = arith.constant 0 : index
    %3 = vector.load %arg1[%c0, %c0_1] : memref<16x128xf32, #tpu.memory_space<vmem>>, vector<16x128xf32>
    %c0_2 = arith.constant 0 : index
    %c0_3 = arith.constant 0 : index
    %4 = vector.load %arg2[%c0_2, %c0_3] : memref<128x128xf32, #tpu.memory_space<vmem>>, vector<128x128xf32>
    %cst = arith.constant dense<0.000000e+00> : vector<16x128xf32>
    %5 = tpu.matmul %3, %4, %cst {dimension_numbers = #tpu.dot_dimension_numbers<[1], [0], [0], [1], [0, 0, 1, 1], [], []>} : vector<16x128xf32>, vector<128x128xf32>, vector<16x128xf32> -> vector<16x128xf32>
    %c0_4 = arith.constant 0 : index
    %c0_5 = arith.constant 0 : index
    %6 = vector.load %arg3[%c0_4, %c0_5] : memref<1x128xf32, #tpu.memory_space<vmem>>, vector<1x128xf32>
    %7 = vector.broadcast %6 : vector<1x128xf32> to vector<16x128xf32>
    %8 = arith.addf %5, %7 : vector<16x128xf32>
    %9 = math.tanh %8 : vector<16x128xf32>
    %c0_6 = arith.constant 0 : index
    %c0_7 = arith.constant 0 : index
    %10 = vector.load %arg4[%c0_6, %c0_7] : memref<1x128xf32, #tpu.memory_space<vmem>>, vector<1x128xf32>
    %11 = vector.broadcast %10 : vector<1x128xf32> to vector<16x128xf32>
    %12 = arith.mulf %9, %11 : vector<16x128xf32>
    %cst_8 = arith.constant dense<0.000000e+00> : vector<16xf32>
    %13 = vector.multi_reduction <add>, %12, %cst_8 [1] : vector<16x128xf32> to vector<16xf32>
    %14 = vector.shape_cast %13 : vector<16xf32> to vector<16x1xf32>
    %c0_9 = arith.constant 0 : index
    %c0_10 = arith.constant 0 : index
    %15 = vector.load %arg6[%c0_9, %c0_10] : memref<1x1xf32, #tpu.memory_space<vmem>>, vector<1x1xf32>
    %cst_11 = arith.constant dense<0xFF800000> : vector<1xf32>
    %16 = vector.multi_reduction <maximumf>, %14, %cst_11 [0] : vector<16x1xf32> to vector<1xf32>
    %17 = vector.shape_cast %16 : vector<1xf32> to vector<1x1xf32>
    %18 = arith.maximumf %15, %17 : vector<1x1xf32>
    %19 = arith.subf %15, %18 : vector<1x1xf32>
    %20 = math.exp %19 : vector<1x1xf32>
    %21 = vector.broadcast %18 : vector<1x1xf32> to vector<16x1xf32>
    %22 = arith.subf %14, %21 : vector<16x1xf32>
    %23 = math.exp %22 : vector<16x1xf32>
    %c0_12 = arith.constant 0 : index
    %c0_13 = arith.constant 0 : index
    %24 = vector.load %arg7[%c0_12, %c0_13] : memref<1x1xf32, #tpu.memory_space<vmem>>, vector<1x1xf32>
    %25 = arith.mulf %20, %24 : vector<1x1xf32>
    %cst_14 = arith.constant dense<0.000000e+00> : vector<1xf32>
    %26 = vector.multi_reduction <add>, %23, %cst_14 [0] : vector<16x1xf32> to vector<1xf32>
    %27 = vector.shape_cast %26 : vector<1xf32> to vector<1x1xf32>
    %28 = arith.addf %25, %27 : vector<1x1xf32>
    %c0_15 = arith.constant 0 : index
    %c0_16 = arith.constant 0 : index
    %29 = vector.load %arg7[%c0_15, %c0_16] : memref<1x1xf32, #tpu.memory_space<vmem>>, vector<1x1xf32>
    tpu.vector_store %arg7[%c0_15, %c0_16], %28 {strides = array<i32>} : memref<1x1xf32, #tpu.memory_space<vmem>>, vector<1x1xf32>,
    %cst_17 = arith.constant dense<0.000000e+00> : vector<1x128xf32>
    %30 = tpu.matmul %23, %3, %cst_17 {dimension_numbers = #tpu.dot_dimension_numbers<[0], [0], [1], [1], [0, 1, 1, 1], [], []>} : vector<16x1xf32>, vector<16x128xf32>, vector<1x128xf32> -> vector<1x128xf32>
    %c0_18 = arith.constant 0 : index
    %c0_19 = arith.constant 0 : index
    %31 = vector.load %arg8[%c0_18, %c0_19] : memref<1x128xf32, #tpu.memory_space<vmem>>, vector<1x128xf32>
    %32 = vector.broadcast %20 : vector<1x1xf32> to vector<1x128xf32>
    %33 = arith.mulf %32, %31 : vector<1x128xf32>
    %34 = arith.addf %33, %30 : vector<1x128xf32>
    %c0_20 = arith.constant 0 : index
    %c0_21 = arith.constant 0 : index
    %35 = vector.load %arg8[%c0_20, %c0_21] : memref<1x128xf32, #tpu.memory_space<vmem>>, vector<1x128xf32>
    tpu.vector_store %arg8[%c0_20, %c0_21], %34 {strides = array<i32>} : memref<1x128xf32, #tpu.memory_space<vmem>>, vector<1x128xf32>,
    %c0_22 = arith.constant 0 : index
    %c0_23 = arith.constant 0 : index
    %36 = vector.load %arg6[%c0_22, %c0_23] : memref<1x1xf32, #tpu.memory_space<vmem>>, vector<1x1xf32>
    tpu.vector_store %arg6[%c0_22, %c0_23], %18 {strides = array<i32>} : memref<1x1xf32, #tpu.memory_space<vmem>>, vector<1x1xf32>,
    %c3_i32 = arith.constant 3 : i32
    %37 = arith.cmpi eq, %arg0, %c3_i32 : i32
    %38 = arith.extui %37 : i1 to i32
    %c0_i32_24 = arith.constant 0 : i32
    %39 = arith.cmpi ne, %38, %c0_i32_24 : i32
    scf.if %39 {
      %c0_25 = arith.constant 0 : index
      %c0_26 = arith.constant 0 : index
      %40 = vector.load %arg7[%c0_25, %c0_26] : memref<1x1xf32, #tpu.memory_space<vmem>>, vector<1x1xf32>
      %41 = tpu.reciprocal %40 : vector<1x1xf32> -> vector<1x1xf32>
      %c0_27 = arith.constant 0 : index
      %c0_28 = arith.constant 0 : index
      %42 = vector.load %arg8[%c0_27, %c0_28] : memref<1x128xf32, #tpu.memory_space<vmem>>, vector<1x128xf32>
      %43 = vector.broadcast %41 : vector<1x1xf32> to vector<1x128xf32>
      %44 = arith.mulf %42, %43 : vector<1x128xf32>
      %c0_29 = arith.constant 0 : index
      %c0_30 = arith.constant 0 : index
      %45 = vector.load %arg5[%c0_29, %c0_30] : memref<1x128xf32, #tpu.memory_space<vmem>>, vector<1x128xf32>
      tpu.vector_store %arg5[%c0_29, %c0_30], %44 {strides = array<i32>} : memref<1x128xf32, #tpu.memory_space<vmem>>, vector<1x128xf32>,
    } else {
    }
    return
  }
  func.func @transform_0(%arg0: i32) -> (i32, i32) {
    %c0_i32 = arith.constant 0 : i32
    %c0_i32_0 = arith.constant 0 : i32
    return %arg0, %c0_i32 : i32, i32
  }
  func.func @transform_1(%arg0: i32) -> (i32, i32) {
    %c0_i32 = arith.constant 0 : i32
    %c0_i32_0 = arith.constant 0 : i32
    %c0_i32_1 = arith.constant 0 : i32
    return %c0_i32, %c0_i32_0 : i32, i32
  }
  func.func @transform_2(%arg0: i32) -> (i32, i32) {
    %c0_i32 = arith.constant 0 : i32
    %c0_i32_0 = arith.constant 0 : i32
    %c0_i32_1 = arith.constant 0 : i32
    return %c0_i32, %c0_i32_0 : i32, i32
  }
  func.func @transform_3(%arg0: i32) -> (i32, i32) {
    %c0_i32 = arith.constant 0 : i32
    %c0_i32_0 = arith.constant 0 : i32
    %c0_i32_1 = arith.constant 0 : i32
    return %c0_i32, %c0_i32_0 : i32, i32
  }
  func.func @transform_4(%arg0: i32) -> (i32, i32) {
    %c0_i32 = arith.constant 0 : i32
    %c0_i32_0 = arith.constant 0 : i32
    %c0_i32_1 = arith.constant 0 : i32
    return %c0_i32, %c0_i32_0 : i32, i32
  }
}

</mosaic_0001>

<bundles_post_ra>
// kernel: tpu_custom_call.1
= control target key start
LH: loop header
LB: loop body
LE: loop exit
PB: predicated region body
PF: predicated region fallthrough
CT: control target
= control target key end

     0   :  { %9 = vsyncpa [#allocation6], 0  ;;  %s1144_s0 = inlined_call_operand.hbm [shape: f32[64,128], index: 0, kind: input, shape index: {}]   ;;  %s1145_s1 = inlined_call_operand.hbm [shape: f32[128,128], index: 1, kind: input, shape index: {}]   ;;  %s1146_s2 = inlined_call_operand.vmem [shape: f32[1,128], index: 2, kind: input, shape index: {}]   ;;  %s1147_s3 = inlined_call_operand.vmem [shape: f32[1,128], index: 3, kind: input, shape index: {}]   ;;  %s1148_s4 = inlined_call_operand.hbm [shape: f32[1,128], index: 4, kind: output, shape index: {}]  }
   0x1   :  { %11 = vsyncpa [#allocation6 + $0x1], 0 }
   0x2   :  { %12 = vsyncpa [#allocation9], 0 }
   0x3   :  { %13 = vsyncpa [#allocation7], 0  ;;  %s950_s15 = smov 0   ;;  %s952_s16 = smov 0  }
   0x4   :  { %s954_s17 = smov 0   ;;  %s956_s18 = smov 0  }
   0x5 LB: > { %s969_s19 = sadd.s32 4294967295, %s911_s18   ;;  %p39_p0 = scmp.ne.s32.totalorder %s903_s16, %s899_s15  ;;  %s911_s18 = sphi %s956_s18, %s1164_s18   ;;  %s907_s17 = sphi %s954_s17, %s1163_s17   ;;  %s903_s16 = sphi %s952_s16, %s1162_s16   ;;  %s899_s15 = sphi %s950_s15, %s1161_s15  }
   0x6   : > { %p1149_p1 = scmp.eq.s32.totalorder %s969_s19, 0  ;;  %p588_p2 = scmp.ge.s32.totalorder %s911_s18, 1 }
   0x7   : > { %p134_p3 = scmp.lt.s32.totalorder %s911_s18, 5  ;;  %s913_s22 = smov [#allocation8]  }
   0x8   : > { %p978_p5 = por %p1149_p1, %p39_p0  ;;  %s146_s23 = sshll.u32 %s913_s22, 4  ;;  %s147_s23 = int_to_ptr.vmem [resolvable:$true] %s146_s23 }
   0x9   : > { %p982_p6 = pnand %p588_p2, %p134_p3  ;;  %s995_s25 = sadd.s32 1, %s911_s18  }
   0xa   : > { %s1152_s20 = scalar_select %p978_p5, 1, 0 }
   0xb   : > { %s1153_s21 = scalar_select %p982_p6, 1, 0 }
   0xc   : > { %p715_p7 = pneg %p982_p6  ;;  %s26_s26 = sadd.s32 1, %s907_s17 }
   0xd   : > { %s23_s27 = ssub.s32 %s911_s18, %s995_s25  ;;  %s785_s30 = scalar_lea.hbm %s1145_s1, 2048 }
   0xe   : > { %p990_p8 = pnand %p715_p7, %p1149_p1  ;;  %p786_p9 = scmp.ne.s32.totalorder %s1145_s1, %s785_s30 }
   0xf   : > { %p792_p13 = scmp.lt.u32.totalorder %s785_s30, %s1145_s1 }
  0x10   : > { %p787_p10 = pneg %p990_p8 }
  0x12   : > { %p788_p11 = pnand %p787_p10, %p786_p9 }
  0x14   : > { %p789_p12 = pneg %p788_p11 }
  0x16   : > { %p794_p0 = pnand %p792_p13, %p789_p12 }
  0x18   : > { %797 = shalt.err (!%p794_p0)
}
  0x19   : > { %s798_s9 = scalar_lea.vmem %s147_s23, 2048  ;;  %p806_p4 = scmp.lt.s32.totalorder %s147_s23, %s147_s23 }
  0x1a   : > { %p799_p2 = scmp.ne.s32.totalorder %s147_s23, %s798_s9  ;;  %p807_p1 = scmp.lt.s32.totalorder %s798_s9, %s798_s9 }
  0x1c   : > { %p801_p3 = pnand %p799_p2, %p787_p10  ;;  %p808_p5 = por %p807_p1, %p806_p4 }
  0x1e   : > { %p802_p7 = pneg %p801_p3 }
  0x20   : > { %p809_p6 = pnand %p808_p5, %p802_p7 }
  0x22   : > { %812 = shalt.err (!%p809_p6)
}
  0x23   : > { %s914_s10 = smov 128   ;;  %s915_s11 = smov 8  }
  0x24   : > { %718 = dma.hbm_to_vmem [thread:$0]  (!%p990_p8), %s1145_s1, 2048, %s147_s23, [#allocation9], %s914_s10, %s914_s10, %s915_s11  }
  0x25   : > { %p24_p1 = scmp.eq.s32.totalorder %s23_s27, 0  ;;  %p33_p4 = scmp.ne.s32.totalorder %s907_s17, %s903_s16 }
  0x26   : > { %p34_p5 = scmp.eq.s32.totalorder %s911_s18, 0  ;;  %p724_p6 = scmp.lt.s32.totalorder %s911_s18, 4 }
  0x27   : > { %s1024_s14 = scalar_select %p24_p1, %s907_s17, %s26_s26  }
  0x28   : > { %p35_p9 = por %p34_p5, %p33_p4  ;;  %s166_s15 = sand.u32 1, %s907_s17  }
  0x29   : > { %s591_s22 = sshll.u32 %s166_s15, 4  ;;  %s606_s28 = sshll.u32 %s911_s18, 8 }
  0x2a   : > { %s1031_s24 = scalar_lea.hbm %s1144_s0, %s606_s28  ;;  %s170_s23 = scalar_lea.vmem [#allocation5], %s591_s22 }
  0x2b   : > { %s177_s27 = sshll.u32 %s170_s23, 4  ;;  %p1035_p8 = pnand %p724_p6, %p35_p9  ;;  %s1033_s27 = int_to_ptr.vmem [resolvable:$true] %s177_s27 }
  0x2c   : > { %s1039_s18 = scalar_lea.sflag [#allocation6], %s166_s15  ;;  %s813_s5 = scalar_lea.hbm %s1031_s24, 256 }
  0x2d   : > { %p814_p10 = scmp.ne.s32.totalorder %s1031_s24, %s813_s5  ;;  %p815_p11 = pneg %p1035_p8 }
  0x2e   : > { %s818_s8 = scalar_lea.hbm %s1144_s0, 1024  ;;  %p819_p0 = scmp.lt.u32.totalorder %s1031_s24, %s1144_s0 }
  0x2f   : > { %p816_p12 = pnand %p815_p11, %p814_p10  ;;  %p820_p2 = scmp.lt.u32.totalorder %s818_s8, %s813_s5 }
  0x30   : > { %p822_p7 = scmp.lt.u32.totalorder %s813_s5, %s1031_s24 }
  0x31   : > { %p817_p13 = pneg %p816_p12  ;;  %p821_p3 = por %p820_p2, %p819_p0 }
  0x33   : > { %p823_p1 = por %p822_p7, %p821_p3 }
  0x35   : > { %p824_p4 = pnand %p823_p1, %p817_p13 }
  0x37   : > { %827 = shalt.err (!%p824_p4)
}
  0x38   : > { %s828_s13 = scalar_lea.vmem %s1033_s27, 256  ;;  %s916_s15 = smov [#allocation5]  }
  0x39   : > { %p829_p5 = scmp.ne.s32.totalorder %s1033_s27, %s828_s13  ;;  %s833_s22 = sshll.u32 %s916_s15, 4  ;;  %s834_s22 = int_to_ptr.vmem [resolvable:$false] %s833_s22 }
  0x3a   : > { %s835_s28 = scalar_lea.vmem %s834_s22, 512  ;;  %p836_p10 = scmp.lt.s32.totalorder %s1033_s27, %s834_s22 }
  0x3b   : > { %p831_p6 = pnand %p829_p5, %p815_p11  ;;  %p837_p12 = scmp.lt.s32.totalorder %s835_s28, %s828_s13 }
  0x3d   : > { %p832_p9 = pneg %p831_p6  ;;  %p838_p0 = por %p837_p12, %p836_p10 }
  0x3f   : > { %p839_p2 = pnand %p838_p0, %p832_p9 }
  0x41   : > { %842 = shalt.err (!%p839_p2)
}
  0x42   : > { %722 = dma.hbm_to_vmem [thread:$0]  (!%p1035_p8), %s1031_s24, 256, %s1033_s27, %s1039_s18, %s914_s10, %s914_s10, %s915_s11  }
  0x43   : > { %p1156_p11 = scmp.ne.s32.totalorder %s1153_s21, 0 }
  0x44   : > { %s191_s29 = sand.u32 (!%p1156_p11), 1, %s903_s16   ;;  %p1157_p13 = scmp.ne.s32.totalorder (!%p1156_p11), %s1152_s20, 0 }
  0x45   : > { %189 = sbr.rel (%p1156_p11) target bundleno = 910 (0x38e), region = 36  ;;  %s1073_s30 = sshll.u32 (!%p1156_p11), %s191_s29, 4 }
  0x46   : > { %s192_s23 = scalar_lea.sflag (!%p1156_p11), [#allocation6], %s191_s29  ;;  %s195_s5 = scalar_lea.vmem (!%p1156_p11), [#allocation5], %s1073_s30 }
  0x4c   : > { %886 = dma.done.wait (%p1157_p13), %s192_s23, 256  }
  0x4d   : > { %888 = vsyncadd (%p1157_p13), %s192_s23, 4294967040  ;;  %p1158_p3 = scmp.eq.s32.totalorder %s969_s19, 0 }
  0x4f   : > { %890 = dma.done.wait (%p1158_p3), [#allocation9], 2048   ;;  %p1159_p8 = pmov %p1158_p3 }
  0x50   : > { %p1160_p7 = scmp.ne.s32.totalorder %s969_s19, 0 }
  0x51   : > { %892 = vsyncadd (%p1159_p8), [#allocation9], 4294965248  ;;  %vm224_vm0 = vcmask (!%p1160_p7), 0   ;;  %v917_v0 = vmov (!%p1160_p7), -inf   ;;  %v918_v1 = vmov (!%p1160_p7), 0.0  }
  0x52   : > { %223 = sbr.rel (%p1160_p7) target bundleno = 89 (0x59), region = 48  ;;  %225 = vst.msk [vmem:[#allocation2] sm:$0x1] (!%p1160_p7), %vm224_vm0, %v917_v0  ;;  %226 = vst.msk [vmem:[#allocation3] sm:$0x1] (!%p1160_p7), %vm224_vm0, %v918_v1 }
  0x53   : > { %227 = vst [vmem:[#allocation4] sm:$0x1] (!%p1160_p7), %v918_v1 }
  0x59 PF: > { %v230_v2 = vld [vmem:[#allocation8] sm:$0xff]  ;;  %v231_v3 = vld [vmem:[#allocation8 + $0x8] sm:$0xff]  ;;  %v232_v4 = vld [vmem:[#allocation8 + $0x10] sm:$0xff]  ;;  %v919_v38 = vmov 0   ;;  %v920_v39 = vmov 0.0|0.0   ;;  %v356_v44 = vlaneseq  ;;  %vm380_vm1 = vcmask 0  }
  0x5a   : > { %v670_v5 = vpack.c.bf16 %v231_v3, %v230_v2  ;;  %v233_v6 = vld [vmem:[#allocation8 + $0x18] sm:$0xff]  ;;  %v234_v8 = vld [vmem:[#allocation8 + $0x20] sm:$0xff]  ;;  %v235_v9 = vld [vmem:[#allocation8 + $0x28] sm:$0xff]  ;;  %771 = vset.pattern.permute.xlu0 %v919_v38  ;;  %702 = vmatprep.subr.bf16.mxu1 %v920_v39  ;;  %vm369_vm2 = vcmask 7168   ;;  %vm921_vm3 = vmmov 0   ;;  %v922_v0 = vmov 0.0  }
  0x5b   : > { %v674_v7 = vpack.c.bf16 %v233_v6, %v232_v4  ;;  %v678_v10 = vpack.c.bf16 %v235_v9, %v234_v8  ;;  %v1088_v11 = vld [vmem:[%s195_s5] sm:$0xff]  ;;  %v237_v13 = vld [vmem:[#allocation8 + $0x38] sm:$0xff]  ;;  %v239_v16 = vld [vmem:[#allocation8 + $0x48] sm:$0xff]  ;;  %v357_v47 = vshrl.u32 %v356_v44, 7  ;;  %667 = vmatprep.mubr.msk.f32.mxu1 %vm921_vm3, %v922_v0  ;;  %vm414_vm4 = vcmask 130048   ;;  %p601_p1 = scmp.ne.s32.totalorder %s969_s19, 3 }
  0x5c   : > { %671 = vmatprep.subr.bf16.mxu0 %v670_v5  ;;  %v236_v12 = vld [vmem:[#allocation8 + $0x30] sm:$0xff]  ;;  %660 = vmatprep.mubr.f32.mxu0 %v1088_v11  ;;  %v238_v15 = vld [vmem:[#allocation8 + $0x40] sm:$0xff]  ;;  %v241_v19 = vld [vmem:[#allocation8 + $0x58] sm:$0xff] }
  0x5d   : > { %673 = vmatpush3.bf16.msra.mxu0 %v670_v5  ;;  %v682_v14 = vpack.c.bf16 %v237_v13, %v236_v12  ;;  %v686_v17 = vpack.c.bf16 %v239_v16, %v238_v15  ;;  %v240_v18 = vld [vmem:[#allocation8 + $0x50] sm:$0xff]  ;;  %v242_v21 = vld [vmem:[#allocation8 + $0x60] sm:$0xff]  ;;  %v243_v22 = vld [vmem:[#allocation8 + $0x68] sm:$0xff]  ;;  %v1099_v51 = vsub.s32 0, %v357_v47 }
  0x5e   : > { %675 = vmatprep.subr.bf16.mxu0 %v674_v7  ;;  %v690_v20 = vpack.c.bf16 %v241_v19, %v240_v18  ;;  %v694_v23 = vpack.c.bf16 %v243_v22, %v242_v21  ;;  %v244_v24 = vld [vmem:[#allocation8 + $0x70] sm:$0xff]  ;;  %v245_v25 = vld [vmem:[#allocation8 + $0x78] sm:$0xff] }
  0x5f   : > { %v698_v26 = vpack.c.bf16 %v245_v25, %v244_v24  ;;  %v229_v27 = vld [vmem:[%s195_s5 + $0x8] sm:$0xff] }
  0x60   : > { %v598_v28 = vld [vmem:[%s1146_s2] ss:$0 sm:$0xff]  ;;  %v703_v62 = vpack.c.bf16 %v229_v27, %v1088_v11  ;;  %v367_v9 = vld [vmem:[#allocation3] sm:$0x1] }
  0x61   : > { %677 = vmatpush3.bf16.msra.mxu0 %v674_v7  ;;  %v599_v33 = vld [vmem:[%s1147_s3] ss:$0 sm:$0xff] }
  0x62   : > { %679 = vmatprep.subr.bf16.mxu0 %v678_v10  ;;  %v343_v50 = vld [vmem:[#allocation2] sm:$0x1]  ;;  %704 = vmatpush3.bf16.msra.mxu1 %v703_v62 }
  0x65   : > { %681 = vmatpush3.bf16.msra.mxu0 %v678_v10 }
  0x66   : > { %683 = vmatprep.subr.bf16.mxu0 %v682_v14 }
  0x69   : > { %685 = vmatpush3.bf16.msra.mxu0 %v682_v14 }
  0x6a   : > { %687 = vmatprep.subr.bf16.mxu0 %v686_v17 }
  0x6d   : > { %689 = vmatpush3.bf16.msra.mxu0 %v686_v17  ;;  %v488_v17 = vld [vmem:[#allocation4] sm:$0x1] }
  0x6e   : > { %691 = vmatprep.subr.bf16.mxu0 %v690_v20 }
  0x71   : > { %693 = vmatpush3.bf16.msra.mxu0 %v690_v20 }
  0x72   : > { %695 = vmatprep.subr.bf16.mxu0 %v694_v23 }
  0x75   : > { %697 = vmatpush3.bf16.msra.mxu0 %v694_v23  ;;  %v923_v23 = vmov (!%p601_p1), 0  }
  0x76   : > { %699 = vmatprep.subr.bf16.mxu0 %v698_v26 }
  0x79   : > { %701 = vmatpush3.bf16.msra.mxu0 %v698_v26 }
  0x7c   : > { %661 = vmatmul.mubr.f32.vlgmr.msra.gmra.mrb[0].mxu0 %v229_v27 }
 0x14f   : > { %v662_v29 = vpop.f32.mrb[0].mxu0 }
 0x150   : > { %v319_v30 = vpop.f32.mrb[1].mxu0  ;;  %v325_v31 = vadd.f32 %v662_v29, %v598_v28 }
 0x151   : > { %v320_v32 = vadd.f32 %v598_v28, %v319_v30 }
 0x153   : > { %772 = vtanh.f32 %v320_v32 }
 0x154   : > { %774 = vtanh.f32 %v325_v31 }
 0x15d   : > { %v773_v34 = vpop.eup %772 }
 0x15e   : > { %v337_v35 = vmul.f32 %v773_v34, %v599_v33  ;;  %v775_v36 = vpop.eup %774 }
 0x15f   : > { %v338_v37 = vmul.f32 %v775_v36, %v599_v33 }
 0x160   : > { %339 = vadd.xlane.f32.xlu0 %v337_v35 }
 0x164   : > { %341 = vadd.xlane.f32.xlu0 %v338_v37 }
 0x1ed   : > { %v340_v40 = vpop.xlane.xlu0 %339 }
 0x1f1   : > { %v342_v41 = vpop.xlane.xlu0 %341 }
 0x1f2   : > { %v344_v42 = vmax.f32 %v340_v40, %v342_v41 }
 0x1f4   : > { %v345_v43 = vrot.slane %v344_v42, 4 }
 0x1f6   : > { %v346_v45 = vmax.f32 %v344_v42, %v345_v43 }
 0x1f8   : > { %v347_v46 = vrot.slane %v346_v45, 2 }
 0x1fa   : > { %v348_v48 = vmax.f32 %v346_v45, %v347_v46 }
 0x1fc   : > { %v349_v49 = vrot.slane %v348_v48, 1 }
 0x1fe   : > { %v350_v52 = vmax.f32 %v348_v48, %v349_v49 }
 0x200   : > { %v351_v53 = vmax.f32 %v343_v50, %v350_v52 }
 0x202   : > { %v352_v54 = vsub.f32 %v343_v50, %v351_v53  ;;  %v359_v55 = vrot.slane %v351_v53, %v1099_v51  ;;  %501 = vst.msk [vmem:[#allocation2] sm:$0x1] %vm380_vm1, %v351_v53 }
 0x204   : > { %v353_v56 = vmul.f32 1.442695, %v352_v54  ;;  %v361_v57 = vsub.f32 %v340_v40, %v359_v55  ;;  %v362_v58 = vsub.f32 %v342_v41, %v359_v55 }
 0x206   : > { %776 = vpow2.f32 %v353_v56  ;;  %v363_v59 = vmul.f32 1.442695, %v361_v57  ;;  %v365_v60 = vmul.f32 1.442695, %v362_v58 }
 0x208   : > { %778 = vpow2.f32 %v363_v59 }
 0x209   : > { %780 = vpow2.f32 %v365_v60 }
 0x210   : > { %v777_v61 = vpop.eup %776 }
 0x211   : > { %491 = vperm.xlu0 %771, %v777_v61   ;;  %v368_v12 = vmul.f32 %v777_v61, %v367_v9 }
 0x212   : > { %v779_v63 = vpop.eup %778 }
 0x213   : > { %v781_v1 = vpop.eup %780  ;;  %v370_v2 = vsel %vm369_vm2, %v779_v63, 0.0  ;;  %382 = vxpose.xlu1.b32.start [1/2] (short) (narrow) %v779_v63, 8 }
 0x214   : > { %v371_v3 = vsel %vm369_vm2, %v781_v1, 0.0 }
 0x215   : > { %v372_v4 = vadd.f32 %v371_v3, %v370_v2  ;;  %782 = vset.pattern.permute.xlu0 (!%p601_p1), %v923_v23 }
 0x217   : > { %v373_v5 = vrot.slane %v372_v4, 4  ;;  %383 = vxpose.xlu1.b32.end [2/2] (short) (narrow) %v781_v1, 8 }
 0x219   : > { %v374_v6 = vadd.f32 %v373_v5, %v372_v4 }
 0x21b   : > { %v375_v7 = vrot.slane %v374_v6, 2 }
 0x21d   : > { %v376_v8 = vadd.f32 %v375_v7, %v374_v6 }
 0x21f   : > { %v377_v10 = vrot.slane %v376_v8, 1 }
 0x221   : > { %v378_v11 = vadd.f32 %v377_v10, %v376_v8 }
 0x223   : > { %v379_v13 = vadd.f32 %v378_v11, %v368_v12 }
 0x225   : > { %381 = vst.msk [vmem:[#allocation3] sm:$0x1] %vm380_vm1, %v379_v13 }
 0x22c   : > { %v506_v22 = vld [vmem:[#allocation3] sm:$0x1] (!%p601_p1) }
 0x22d   : > { %783 = vrcp.f32 (!%p601_p1), %v506_v22 }
 0x237   : > { %v784_v24 = vpop.eup (!%p601_p1), %783 }
 0x238   : > { %511 = vperm.xlu0 (!%p601_p1), %782, %v784_v24  }
 0x290   : > { %v492_v15 = vpop.permute.xlu0 %491 }
 0x291   : > { %v497_v16 = vrot.slane %v492_v15, %v1099_v51 }
 0x293   : > { %v398_v14 = vpop.trf.xlu1  ;;  %v498_v18 = vmul.f32 %v497_v16, %v488_v17 }
 0x294   : > { %668 = vmatmul.mubr.msk.f32.vlgmr.msra.gmra.mrb[0].mxu1 %vm414_vm4, %v398_v14 }
 0x2b7   : > { %v512_v26 = vpop.permute.xlu0 (!%p601_p1), %511 }
 0x2b8   : > { %v517_v27 = vrot.slane (!%p601_p1), %v512_v26, %v1099_v51 }
 0x364   : > { %505 = sbr.rel (%p601_p1) target bundleno = 885 (0x375), region = 52 }
 0x367   : > { %v484_v19 = vpop.f32.mrb[0].mxu1 }
 0x368   : > { %v499_v20 = vadd.f32 %v498_v18, %v484_v19  ;;  %v669_v21 = vpop.f32.mrb[1].mxu1 }
 0x36a   : > { %500 = vst [vmem:[#allocation4] sm:$0x1] %v499_v20 }
 0x371   : > { %v508_v25 = vld [vmem:[#allocation4] sm:$0x1] }
 0x372   : > { %v518_v28 = vmul.f32 %v517_v27, %v508_v25 }
 0x374   : > { %519 = vst [vmem:[#allocation10] sm:$0x1] %v518_v28 }
 0x375 PF: > { %p726_p4 = scmp.eq.s32.totalorder %s969_s19, 3  ;;  %s924_s24 = smov [#allocation10]  }
 0x376   : > { %s527_s27 = sshll.u32 %s924_s24, 4  ;;  %s528_s27 = int_to_ptr.vmem [resolvable:$true] %s527_s27 }
 0x377   : > { %s843_s26 = scalar_lea.vmem %s528_s27, 16  ;;  %s849_s18 = scalar_lea.vmem %s528_s27, 32 }
 0x378   : > { %p844_p5 = scmp.ne.s32.totalorder %s528_s27, %s843_s26  ;;  %p850_p10 = scmp.lt.s32.totalorder %s528_s27, %s528_s27 }
 0x379   : > { %p851_p12 = scmp.lt.s32.totalorder %s849_s18, %s843_s26 }
 0x37a   : > { %p845_p6 = pnand %p844_p5, %p726_p4 }
 0x37b   : > { %p852_p0 = por %p851_p12, %p850_p10 }
 0x37c   : > { %p846_p9 = pneg %p845_p6 }
 0x37e   : > { %p853_p2 = pnand %p852_p0, %p846_p9 }
 0x380   : > { %856 = shalt.err (!%p853_p2)
}
 0x381   : > { %s857_s8 = scalar_lea.hbm %s1148_s4, 16 }
 0x382   : > { %p858_p11 = scmp.ne.s32.totalorder %s1148_s4, %s857_s8  ;;  %p863_p8 = scmp.lt.u32.totalorder %s857_s8, %s1148_s4 }
 0x384   : > { %p859_p13 = pnand %p858_p11, %p726_p4 }
 0x386   : > { %p860_p3 = pneg %p859_p13 }
 0x388   : > { %p865_p7 = pnand %p863_p8, %p860_p3 }
 0x38a   : > { %868 = shalt.err (!%p865_p7)
}
 0x38b   : > { %712 = dma.vmem_to_hbm [thread:$0]  (%p726_p4), %s528_s27, 16, %s1148_s4, [#allocation7]  }
 0x38c   : > { %894 = dma.done.wait (%p726_p4), [#allocation7], 16  }
 0x38d   : > { %896 = vsyncadd (%p726_p4), [#allocation7], 4294967280 }
 0x38e PF: > { %p16_p1 = scmp.ge.s32.totalorder %s995_s25, 6   ;;  %s1161_s15 = smov %s903_s16 }
 0x38f   : > { %s1162_s16 = smov %s907_s17  ;;  %s1163_s17 = smov %s1024_s14 }
 0x390   : > { %s1164_s18 = smov %s995_s25  ;;  %18 = sbr.rel (!%p16_p1) target bundleno = 5 (0x5), region = 85 }
 0x397   :  { %540 = vsyncpa [#allocation6], 1 }
 0x398   :  { %542 = vsyncpa [#allocation6 + $0x1], 1 }
 0x399   :  { %543 = vsyncpa [#allocation9], 1 }
 0x39a   :  { %544 = vsyncpa [#allocation7], 1 }
 0x39b   :  { %546 = vsyncpa [#allocation7 + $0x1], 1 }

</bundles_post_ra>
